<compile_context>
chip_gen: v5e
topology: v5e:2x2
jax: 0.10.0
libtpu: 0.0.40
codegen_flags: <defaults>
</compile_context>

<pallas_src>
import functools

import jax
import jax.numpy as jnp
from jax.experimental import pallas as pl
from jax.experimental.pallas import tpu as pltpu


def _vae_encoder_kernel(x_ref, w1_ref, b1_ref, w23_ref, b23_ref, eps_ref,
                        z_ref, kl_ref, *, latent, latent_pad):
    # hidden = relu(x @ W1 + b1)      (bf16 x bf16 -> f32 accumulate on the MXU)
    h = jnp.dot(x_ref[...], w1_ref[...], preferred_element_type=jnp.float32)
    h = jnp.maximum(h + b1_ref[...], 0.0)

    # Fused projection: [mu | log_sigma] = h @ W23 + b23 in ONE matmul.
    # W23 columns [0:latent) hold W2, columns [latent_pad:latent_pad+latent)
    # hold W3, the rest are zero padding (lane-dense layout).
    ml = jnp.dot(h.astype(jnp.bfloat16), w23_ref[...],
                 preferred_element_type=jnp.float32) + b23_ref[...]

    mu = ml[:, :latent_pad]            # (B, 128) — static, lane-aligned slices
    log_sigma = ml[:, latent_pad:]     # (B, 128)
    sigma = jnp.exp(log_sigma)         # f32 on the EUP

    # Reparameterization: z = mu + sigma * eps (eps is zero in padded lanes and
    # in eval mode).  Full 128-lane (unmasked) store.
    z_ref[...] = mu + sigma * eps_ref[...]

    # kl = sum(sigma^2 + mu^2 - log(sigma) - 1/2) over the valid latent lanes.
    # Padded lanes would each contribute 0.5 (mu=0, log_sigma=0), so mask them.
    lane = jax.lax.broadcasted_iota(jnp.int32, mu.shape, 1)
    kl_terms = sigma * sigma + mu * mu - log_sigma - 0.5
    kl_terms = jnp.where(lane < latent, kl_terms, 0.0)
    kl_ref[0, 0] = jnp.sum(kl_terms)


def vae_encoder_forward(x, params, eps, mode="train"):
    """x: (B, 3, H, W) float32.  Returns (z, kl) matching the torch module."""
    w1, b1, w2, b2, w3, b3 = params
    B = x.shape[0]
    d_in = x.shape[1] * x.shape[2] * x.shape[3]
    feature_size = w1.shape[1]
    latent = w2.shape[1]
    latent_pad = ((latent + 127) // 128) * 128   # lane-dense latent width

    x_flat = x.reshape(B, d_in)                  # torch.flatten(x, start_dim=1)

    # bf16 MXU inputs (dominant DMA traffic is the W1 tile); f32 accumulation.
    x_bf = x_flat.astype(jnp.bfloat16)
    w1_bf = w1.astype(jnp.bfloat16)

    # Fuse + lane-pad the mu / log_sigma projections.
    w23 = jnp.zeros((feature_size, 2 * latent_pad), jnp.float32)
    w23 = w23.at[:, :latent].set(w2)
    w23 = w23.at[:, latent_pad:latent_pad + latent].set(w3)
    w23_bf = w23.astype(jnp.bfloat16)

    b23 = jnp.zeros((1, 2 * latent_pad), jnp.float32)
    b23 = b23.at[:, :latent].set(b2)
    b23 = b23.at[:, latent_pad:latent_pad + latent].set(b3)

    if mode != "train":
        eps = jnp.zeros((B, latent), jnp.float32)   # eval: z = mu
    eps_pad = jnp.zeros((B, latent_pad), jnp.float32).at[:, :latent].set(eps)

    kernel = functools.partial(_vae_encoder_kernel,
                               latent=latent, latent_pad=latent_pad)

    vmem = pl.BlockSpec(memory_space=pltpu.MemorySpace.VMEM)
    z_pad, kl = pl.pallas_call(
        kernel,
        in_specs=[vmem, vmem, vmem, vmem, vmem, vmem],
        out_specs=(
            pl.BlockSpec(memory_space=pltpu.MemorySpace.VMEM),   # z (lane-dense)
            pl.BlockSpec(memory_space=pltpu.MemorySpace.SMEM),   # kl scalar
        ),
        out_shape=(
            jax.ShapeDtypeStruct((B, latent_pad), jnp.float32),
            jax.ShapeDtypeStruct((1, 1), jnp.float32),
        ),
    )(x_bf, w1_bf, b1, w23_bf, b23, eps_pad)

    return z_pad[:, :latent], kl[0, 0]


def init_params(key, d_in, feature_size, latent_dims):
    """Deterministic PyTorch-Linear-style init (uniform +/- 1/sqrt(fan_in))."""
    ks = jax.random.split(key, 6)

    def lin(kw, kb, fan_in, fan_out):
        bound = 1.0 / jnp.sqrt(fan_in)
        w = jax.random.uniform(kw, (fan_in, fan_out), jnp.float32, -bound, bound)
        b = jax.random.uniform(kb, (1, fan_out), jnp.float32, -bound, bound)
        return w, b

    w1, b1 = lin(ks[0], ks[1], d_in, feature_size)
    w2, b2 = lin(ks[2], ks[3], feature_size, latent_dims)
    w3, b3 = lin(ks[4], ks[5], feature_size, latent_dims)
    return (w1, b1, w2, b2, w3, b3)


if __name__ == "__main__":
    # Small shapes consistent with the module: latent_dims=8, feature_size=32,
    # height=width=16  ->  input x of shape (B=2, 3, 16, 16).
    B, C, H, W = 2, 3, 16, 16
    feature_size, latent_dims = 32, 8
    d_in = C * H * W

    key = jax.random.PRNGKey(0)
    k_x, k_p, k_eps = jax.random.split(key, 3)

    x = jax.random.normal(k_x, (B, C, H, W), jnp.float32)
    params = init_params(k_p, d_in, feature_size, latent_dims)
    # N(0, 1) sample used by the reparameterization trick (torch's self.N.sample)
    eps = jax.random.normal(k_eps, (B, latent_dims), jnp.float32)

    z, kl = vae_encoder_forward(x, params, eps, mode="train")
    jax.block_until_ready((z, kl))

    # Pure-JAX reference mirroring the kernel's bf16-input / f32-accumulate math.
    w1, b1, w2, b2, w3, b3 = params
    xf = x.reshape(B, d_in)
    xb = xf.astype(jnp.bfloat16).astype(jnp.float32)
    w1b = w1.astype(jnp.bfloat16).astype(jnp.float32)
    h_ref = jnp.maximum(xb @ w1b + b1, 0.0)
    hb = h_ref.astype(jnp.bfloat16).astype(jnp.float32)
    w2b = w2.astype(jnp.bfloat16).astype(jnp.float32)
    w3b = w3.astype(jnp.bfloat16).astype(jnp.float32)
    mu_ref = hb @ w2b + b2
    ls_ref = hb @ w3b + b3
    sig_ref = jnp.exp(ls_ref)
    z_ref = mu_ref + sig_ref * eps
    kl_ref = jnp.sum(sig_ref ** 2 + mu_ref ** 2 - ls_ref - 0.5)

    assert jnp.allclose(z, z_ref, atol=1e-3, rtol=1e-3), (z, z_ref)
    assert jnp.allclose(kl, kl_ref, atol=1e-2, rtol=1e-3), (kl, kl_ref)

    print("KERNEL_OK")
</pallas_src>

<mosaic_0001>
module attributes {stable_mosaic.version = 11 : i64} {
  func.func @_vae_encoder_kernel(%arg0: memref<2x768xbf16, #tpu.memory_space<vmem>>, %arg1: memref<768x32xbf16, #tpu.memory_space<vmem>>, %arg2: memref<1x32xf32, #tpu.memory_space<vmem>>, %arg3: memref<32x256xbf16, #tpu.memory_space<vmem>>, %arg4: memref<1x256xf32, #tpu.memory_space<vmem>>, %arg5: memref<2x128xf32, #tpu.memory_space<vmem>>, %arg6: memref<2x128xf32, #tpu.memory_space<vmem>>, %arg7: memref<1x1xf32, #tpu.memory_space<smem>>) attributes {dimension_semantics = [], scalar_prefetch = 0 : i64, scratch_operands = 0 : i64, tpu.core_type = #tpu.core_type<tc>} {
    %c0 = arith.constant 0 : index
    %c0_0 = arith.constant 0 : index
    %0 = vector.load %arg0[%c0, %c0_0] : memref<2x768xbf16, #tpu.memory_space<vmem>>, vector<2x768xbf16>
    %c0_1 = arith.constant 0 : index
    %c0_2 = arith.constant 0 : index
    %1 = vector.load %arg1[%c0_1, %c0_2] : memref<768x32xbf16, #tpu.memory_space<vmem>>, vector<768x32xbf16>
    %cst = arith.constant dense<0.000000e+00> : vector<2x32xf32>
    %2 = tpu.matmul %0, %1, %cst {dimension_numbers = #tpu.dot_dimension_numbers<[1], [0], [0], [1], [0, 0, 1, 1], [], []>} : vector<2x768xbf16>, vector<768x32xbf16>, vector<2x32xf32> -> vector<2x32xf32>
    %c0_3 = arith.constant 0 : index
    %c0_4 = arith.constant 0 : index
    %3 = vector.load %arg2[%c0_3, %c0_4] : memref<1x32xf32, #tpu.memory_space<vmem>>, vector<1x32xf32>
    %4 = vector.broadcast %3 : vector<1x32xf32> to vector<2x32xf32>
    %5 = arith.addf %2, %4 : vector<2x32xf32>
    %cst_5 = arith.constant 0.000000e+00 : f32
    %6 = vector.broadcast %cst_5 : f32 to vector<2x32xf32>
    %7 = arith.maximumf %5, %6 : vector<2x32xf32>
    %8 = arith.truncf %7 : vector<2x32xf32> to vector<2x32xbf16>
    %c0_6 = arith.constant 0 : index
    %c0_7 = arith.constant 0 : index
    %9 = vector.load %arg3[%c0_6, %c0_7] : memref<32x256xbf16, #tpu.memory_space<vmem>>, vector<32x256xbf16>
    %cst_8 = arith.constant dense<0.000000e+00> : vector<2x256xf32>
    %10 = tpu.matmul %8, %9, %cst_8 {dimension_numbers = #tpu.dot_dimension_numbers<[1], [0], [0], [1], [0, 0, 1, 1], [], []>} : vector<2x32xbf16>, vector<32x256xbf16>, vector<2x256xf32> -> vector<2x256xf32>
    %c0_9 = arith.constant 0 : index
    %c0_10 = arith.constant 0 : index
    %11 = vector.load %arg4[%c0_9, %c0_10] : memref<1x256xf32, #tpu.memory_space<vmem>>, vector<1x256xf32>
    %12 = vector.broadcast %11 : vector<1x256xf32> to vector<2x256xf32>
    %13 = arith.addf %10, %12 : vector<2x256xf32>
    %14 = vector.extract_strided_slice %13 {offsets = [0, 0], sizes = [2, 128], strides = [1, 1]} : vector<2x256xf32> to vector<2x128xf32>
    %15 = vector.extract_strided_slice %13 {offsets = [0, 128], sizes = [2, 128], strides = [1, 1]} : vector<2x256xf32> to vector<2x128xf32>
    %16 = math.exp %15 : vector<2x128xf32>
    %c0_11 = arith.constant 0 : index
    %c0_12 = arith.constant 0 : index
    %17 = vector.load %arg5[%c0_11, %c0_12] : memref<2x128xf32, #tpu.memory_space<vmem>>, vector<2x128xf32>
    %18 = arith.mulf %16, %17 : vector<2x128xf32>
    %19 = arith.addf %14, %18 : vector<2x128xf32>
    %c0_13 = arith.constant 0 : index
    %c0_14 = arith.constant 0 : index
    %20 = vector.load %arg6[%c0_13, %c0_14] : memref<2x128xf32, #tpu.memory_space<vmem>>, vector<2x128xf32>
    tpu.vector_store %arg6[%c0_13, %c0_14], %19 {strides = array<i32>} : memref<2x128xf32, #tpu.memory_space<vmem>>, vector<2x128xf32>,
    %21 = tpu.iota {dimensions = array<i32: 1>} : vector<2x128xi32>
    %22 = arith.mulf %16, %16 : vector<2x128xf32>
    %23 = arith.mulf %14, %14 : vector<2x128xf32>
    %24 = arith.addf %22, %23 : vector<2x128xf32>
    %25 = arith.subf %24, %15 : vector<2x128xf32>
    %cst_15 = arith.constant 5.000000e-01 : f32
    %26 = vector.broadcast %cst_15 : f32 to vector<2x128xf32>
    %27 = arith.subf %25, %26 : vector<2x128xf32>
    %c8_i32 = arith.constant 8 : i32
    %28 = vector.broadcast %c8_i32 : i32 to vector<2x128xi32>
    %29 = arith.cmpi slt, %21, %28 : vector<2x128xi32>
    %cst_16 = arith.constant 0.000000e+00 : f32
    %30 = vector.broadcast %cst_16 : f32 to vector<2x128xf32>
    %31 = arith.select %29, %27, %30 : vector<2x128xi1>, vector<2x128xf32>
    %32 = vector.shape_cast %31 : vector<2x128xf32> to vector<1x2x128xf32>
    %cst_17 = arith.constant dense<0.000000e+00> : vector<1xf32>
    %33 = vector.multi_reduction <add>, %32, %cst_17 [1, 2] : vector<1x2x128xf32> to vector<1xf32>
    %34 = vector.shape_cast %33 : vector<1xf32> to vector<1x1x1xf32>
    %35 = vector.extract %34[0, 0, 0] : f32 from vector<1x1x1xf32>
    %c0_18 = arith.constant 0 : index
    %c0_19 = arith.constant 0 : index
    %36 = memref.load %arg7[%c0_18, %c0_19] : memref<1x1xf32, #tpu.memory_space<smem>>
    memref.store %35, %arg7[%c0_18, %c0_19] : memref<1x1xf32, #tpu.memory_space<smem>>
    return
  }
}

</mosaic_0001>

<bundles_post_ra>
// kernel: tpu_custom_call.1
= control target key start
LH: loop header
LB: loop body
LE: loop exit
PB: predicated region body
PF: predicated region fallthrough
CT: control target
= control target key end

     0   :  { %13 = vsyncpa [#allocation3], 0  ;;  %s1168_s0 = inlined_call_operand.vmem [shape: bf16[2,768], index: 0, kind: input, shape index: {}]   ;;  %s1169_s1 = inlined_call_operand.vmem [shape: bf16[768,32], index: 1, kind: input, shape index: {}]   ;;  %s1170_s2 = inlined_call_operand.vmem [shape: f32[1,32], index: 2, kind: input, shape index: {}]   ;;  %s1171_s3 = inlined_call_operand.vmem [shape: bf16[32,256], index: 3, kind: input, shape index: {}]   ;;  %s1172_s4 = inlined_call_operand.vmem [shape: f32[1,256], index: 4, kind: input, shape index: {}]   ;;  %s1173_s5 = inlined_call_operand.vmem [shape: f32[2,128], index: 5, kind: input, shape index: {}]   ;;  %s1174_s6 = inlined_call_operand.hbm [shape: f32[2,128], index: 6, kind: output, shape index: {0}]   ;;  %s1175_s7 = inlined_call_operand.hbm [shape: f32[1,1], index: 7, kind: output, shape index: {1}]  }
   0x1   :  { %v848_v0 = vld [vmem:[%s1169_s1 + $0x38] sm:$0xff]  ;;  %v847_v2 = vld [vmem:[%s1169_s1 + $0x30] sm:$0xff]  ;;  %v846_v8 = vld [vmem:[%s1169_s1 + $0x28] sm:$0xff] }
   0x2   :  { %v856_v1 = vld [vmem:[%s1169_s1 + $0x78] sm:$0xff]  ;;  %431 = vmatpush.bf16.msra.mxu0 %v848_v0  ;;  %v855_v3 = vld [vmem:[%s1169_s1 + $0x70] sm:$0xff]  ;;  %v854_v9 = vld [vmem:[%s1169_s1 + $0x68] sm:$0xff] }
   0x3   :  { %444 = vmatpush.bf16.msra.mxu1 %v856_v1  ;;  %v864_v4 = vld [vmem:[%s1169_s1 + $0xb8] sm:$0xff]  ;;  %v863_v6 = vld [vmem:[%s1169_s1 + $0xb0] sm:$0xff]  ;;  %v862_v10 = vld [vmem:[%s1169_s1 + $0xa8] sm:$0xff] }
   0x4   :  { %v872_v5 = vld [vmem:[%s1169_s1 + $0xf8] sm:$0xff]  ;;  %457 = vmatpush.bf16.msra.mxu2 %v864_v4  ;;  %v871_v7 = vld [vmem:[%s1169_s1 + $0xf0] sm:$0xff]  ;;  %v870_v11 = vld [vmem:[%s1169_s1 + $0xe8] sm:$0xff] }
   0x5   :  { %470 = vmatpush.bf16.msra.mxu3 %v872_v5  ;;  %v845_v12 = vld [vmem:[%s1169_s1 + $0x20] sm:$0xff]  ;;  %v844_v16 = vld [vmem:[%s1169_s1 + $0x18] sm:$0xff] }
   0x6   :  { %432 = vmatpush.bf16.msra.mxu0 %v847_v2  ;;  %v853_v13 = vld [vmem:[%s1169_s1 + $0x60] sm:$0xff]  ;;  %v852_v18 = vld [vmem:[%s1169_s1 + $0x58] sm:$0xff] }
   0x7   :  { %445 = vmatpush.bf16.msra.mxu1 %v855_v3  ;;  %v28_v14 = vld [vmem:[%s1168_s0] sm:$0x3f] }
   0x8   :  { %458 = vmatpush.bf16.msra.mxu2 %v863_v6  ;;  %v861_v15 = vld [vmem:[%s1169_s1 + $0xa0] sm:$0xff]  ;;  %130 = vst [vmem:[#allocation1] ss:$9 sm:$0xff] %v28_v14 }
   0x9   :  { %471 = vmatpush.bf16.msra.mxu3 %v871_v7  ;;  %v869_v17 = vld [vmem:[%s1169_s1 + $0xe0] sm:$0xff] }
   0xa   :  { %433 = vmatpush.bf16.msra.mxu0 %v846_v8 }
   0xb   :  { %446 = vmatpush.bf16.msra.mxu1 %v854_v9 }
   0xc   :  { %459 = vmatpush.bf16.msra.mxu2 %v862_v10 }
   0xd   :  { %472 = vmatpush.bf16.msra.mxu3 %v870_v11 }
   0xe   :  { %434 = vmatpush.bf16.msra.mxu0 %v845_v12 }
   0xf   :  { %447 = vmatpush.bf16.msra.mxu1 %v853_v13 }
  0x10   :  { %14 = vsyncpa [#allocation4], 0  ;;  %460 = vmatpush.bf16.msra.mxu2 %v861_v15  ;;  %v860_v19 = vld [vmem:[%s1169_s1 + $0x98] sm:$0xff]  ;;  %v843_v21 = vld [vmem:[%s1169_s1 + $0x10] sm:$0xff]  ;;  %vm541_vm0 = vcmask 261120   ;;  %vm586_vm2 = vcmask 1041408  }
  0x11   :  { %473 = vmatpush.bf16.msra.mxu3 %v869_v17  ;;  %v868_v20 = vld [vmem:[%s1169_s1 + $0xd8] sm:$0xff]  ;;  %v851_v22 = vld [vmem:[%s1169_s1 + $0x50] sm:$0xff]  ;;  %v842_v25 = vld [vmem:[%s1169_s1 + $0x8] sm:$0xff]  ;;  %s615_s27 = sshll.u32 %s1175_s7, 4  ;;  %s941_s29 = smov [#allocation5]   ;;  %s616_s27 = int_to_ptr.hbm [resolvable:$true] %s615_s27 }
  0x12   :  { %435 = vmatpush.bf16.msra.mxu0 %v844_v16  ;;  %v859_v23 = vld [vmem:[%s1169_s1 + $0x90] sm:$0xff]  ;;  %v850_v26 = vld [vmem:[%s1169_s1 + $0x48] sm:$0xff]  ;;  %v841_v29 = vld [vmem:[%s1169_s1] sm:$0xff] }
  0x13   :  { %448 = vmatpush.bf16.msra.mxu1 %v852_v18  ;;  %v867_v24 = vld [vmem:[%s1169_s1 + $0xd0] sm:$0xff]  ;;  %v858_v27 = vld [vmem:[%s1169_s1 + $0x88] sm:$0xff]  ;;  %v849_v30 = vld [vmem:[%s1169_s1 + $0x40] sm:$0xff] }
  0x14   :  { %461 = vmatpush.bf16.msra.mxu2 %v860_v19  ;;  %v866_v28 = vld [vmem:[%s1169_s1 + $0xc8] sm:$0xff]  ;;  %v880_v31 = vld [vmem:[%s1169_s1 + $0x138] sm:$0xff]  ;;  %v857_v33 = vld [vmem:[%s1169_s1 + $0x80] sm:$0xff] }
  0x15   :  { %474 = vmatpush.bf16.msra.mxu3 %v868_v20  ;;  %v888_v32 = vld [vmem:[%s1169_s1 + $0x178] sm:$0xff]  ;;  %v131_v34 = vld [vmem:[#allocation1] sm:$0xff]  ;;  %v132_v35 = vld [vmem:[#allocation1 + $0x9] sm:$0xff] }
  0x16   :  { %436 = vmatpush.bf16.msra.mxu0 %v843_v21  ;;  %v865_v36 = vld [vmem:[%s1169_s1 + $0xc0] sm:$0xff]  ;;  %v879_v37 = vld [vmem:[%s1169_s1 + $0x130] sm:$0xff]  ;;  %v878_v41 = vld [vmem:[%s1169_s1 + $0x128] sm:$0xff] }
  0x17   :  { %449 = vmatpush.bf16.msra.mxu1 %v851_v22  ;;  %v887_v38 = vld [vmem:[%s1169_s1 + $0x170] sm:$0xff]  ;;  %v134_v40 = vld [vmem:[#allocation1 + $0x1b] sm:$0xff]  ;;  %v886_v42 = vld [vmem:[%s1169_s1 + $0x168] sm:$0xff] }
  0x18   :  { %462 = vmatpush.bf16.msra.mxu2 %v859_v23  ;;  %v133_v39 = vld [vmem:[#allocation1 + $0x12] sm:$0xff]  ;;  %v877_v43 = vld [vmem:[%s1169_s1 + $0x120] sm:$0xff]  ;;  %v874_v49 = vld [vmem:[%s1169_s1 + $0x108] sm:$0xff] }
  0x19   :  { %475 = vmatpush.bf16.msra.mxu3 %v867_v24  ;;  %v885_v44 = vld [vmem:[%s1169_s1 + $0x160] sm:$0xff]  ;;  %v876_v45 = vld [vmem:[%s1169_s1 + $0x118] sm:$0xff]  ;;  %v875_v47 = vld [vmem:[%s1169_s1 + $0x110] sm:$0xff] }
  0x1a   :  { %437 = vmatpush.bf16.msra.mxu0 %v842_v25  ;;  %v884_v46 = vld [vmem:[%s1169_s1 + $0x158] sm:$0xff]  ;;  %v883_v48 = vld [vmem:[%s1169_s1 + $0x150] sm:$0xff]  ;;  %v882_v50 = vld [vmem:[%s1169_s1 + $0x148] sm:$0xff] }
  0x1b   :  { %450 = vmatpush.bf16.msra.mxu1 %v850_v26  ;;  %v873_v51 = vld [vmem:[%s1169_s1 + $0x100] sm:$0xff]  ;;  %v136_v54 = vld [vmem:[#allocation1 + $0x2d] sm:$0xff]  ;;  %v834_v56 = vld [vmem:[%s1171_s3 + $0x18] sm:$0xf0] }
  0x1c   :  { %463 = vmatpush.bf16.msra.mxu2 %v858_v27  ;;  %v881_v52 = vld [vmem:[%s1169_s1 + $0x140] sm:$0xff]  ;;  %v891_v55 = vld [vmem:[%s1171_s3 + $0x14] sm:$0xf]  ;;  %v832_v58 = vld [vmem:[%s1171_s3 + $0x10] sm:$0xf] }
  0x1d   :  { %476 = vmatpush.bf16.msra.mxu3 %v866_v28  ;;  %v135_v53 = vld [vmem:[#allocation1 + $0x24] sm:$0xff]  ;;  %v837_v57 = vor.u32 %v891_v55, %v834_v56  ;;  %v892_v59 = vld [vmem:[%s1171_s3 + $0x14] sm:$0xf0]  ;;  %v826_v0 = vld [vmem:[%s1171_s3 + $0x8] sm:$0xf0] }
  0x1e   :  { %438 = vmatpush.bf16.msra.mxu0 %v841_v29  ;;  %v833_v60 = vor.u32 %v892_v59, %v832_v58  ;;  %v889_v63 = vld [vmem:[%s1171_s3 + $0x4] sm:$0xf]  ;;  %v824_v1 = vld [vmem:[%s1171_s3] sm:$0xf]  ;;  %v890_v3 = vld [vmem:[%s1171_s3 + $0x4] sm:$0xf0] }
  0x1f   :  { %451 = vmatpush.bf16.msra.mxu1 %v849_v30  ;;  %v829_v2 = vor.u32 %v889_v63, %v826_v0  ;;  %v825_v4 = vor.u32 %v890_v3, %v824_v1  ;;  %v897_v9 = vld [vmem:[%s1170_s2] ss:$0 sm:$0xff] }
  0x20   :  { %464 = vmatpush.bf16.msra.mxu2 %v857_v33  ;;  %v515_v24 = vld [vmem:[%s1172_s4] sm:$0x3]  ;;  %s940_s4 = smov [#allocation2]  }
  0x21   :  { %439 = vmatmul.bf16.vlgmr.msra.gmra.mxu0 %v131_v34  ;;  %477 = vmatpush.bf16.msra.mxu3 %v865_v36  ;;  %v518_v25 = vperm.slane %v515_v24, 1  ;;  %v517_v30 = vperm.slane %v515_v24, 0  ;;  %v577_v34 = vlaneseq  ;;  %s604_s22 = sshll.u32 %s940_s4, 4  ;;  %s605_s22 = int_to_ptr.vmem [resolvable:$true] %s604_s22 }
  0x22   :  { %483 = vmatpush.bf16.msrb.mxu0 %v880_v31  ;;  %452 = vmatmul.bf16.vlgmr.msra.gmra.mxu1 %v132_v35  ;;  %v573_v35 = vld [vmem:[%s1173_s5] sm:$0x3]  ;;  %s606_s5 = sshll.u32 %s1174_s6, 4  ;;  %s607_s5 = int_to_ptr.hbm [resolvable:$true] %s606_s5 }
  0x23   :  { %496 = vmatpush.bf16.msrb.mxu1 %v888_v32  ;;  %465 = vmatmul.bf16.vlgmr.msra.gmra.mxu2 %v133_v39 }
  0x24   :  { %478 = vmatmul.bf16.vlgmr.msra.gmra.mxu3 %v134_v40  ;;  %551 = vmatpush.bf16.msrb.mxu2 %v833_v60  ;;  %v578_v40 = vand.u32 127, %v577_v34 }
  0x25   :  { %564 = vmatpush.bf16.msrb.mxu3 %v837_v57 }
  0x26   :  { %484 = vmatpush.bf16.msrb.mxu0 %v879_v37  ;;  %vm584_vm1 = vcmp.lt.s32.totalorder %v578_v40, 8 }
  0x27   :  { %497 = vmatpush.bf16.msrb.mxu1 %v887_v38 }
  0x28   :  { %552 = vmatpush.bf16.msrb.mxu2 %v825_v4 }
  0x29   :  { %565 = vmatpush.bf16.msrb.mxu3 %v829_v2 }
  0x2a   :  { %485 = vmatpush.bf16.msrb.mxu0 %v878_v41 }
  0x2b   :  { %498 = vmatpush.bf16.msrb.mxu1 %v886_v42 }
  0x2e   :  { %486 = vmatpush.bf16.msrb.mxu0 %v877_v43 }
  0x2f   :  { %499 = vmatpush.bf16.msrb.mxu1 %v885_v44 }
  0x32   :  { %487 = vmatpush.bf16.msrb.mxu0 %v876_v45 }
  0x33   :  { %500 = vmatpush.bf16.msrb.mxu1 %v884_v46 }
  0x36   :  { %488 = vmatpush.bf16.msrb.mxu0 %v875_v47 }
  0x37   :  { %501 = vmatpush.bf16.msrb.mxu1 %v883_v48 }
  0x3a   :  { %489 = vmatpush.bf16.msrb.mxu0 %v874_v49 }
  0x3b   :  { %502 = vmatpush.bf16.msrb.mxu1 %v882_v50 }
  0x3e   :  { %490 = vmatpush.bf16.msrb.mxu0 %v873_v51 }
  0x3f   :  { %503 = vmatpush.bf16.msrb.mxu1 %v881_v52 }
  0x41   :  { %491 = vmatmul.bf16.vlgmr.msrb.gmra.mxu0 %v135_v53 }
  0x42   :  { %504 = vmatmul.bf16.vlgmr.msrb.gmra.mxu1 %v136_v54 }
  0x9e   :  { %v440_v61 = vpop.f32.mrf.mxu0 }
  0x9f   :  { %v453_v62 = vpop.f32.mrf.mxu1  ;;  %v441_v10 = vadd.f32 %v897_v9, %v440_v61 }
  0xa1   :  { %v454_v13 = vadd.f32 %v453_v62, %v441_v10 }
  0xa6   :  { %v442_v5 = vpop.f32.mrf.mxu0  ;;  %v466_v7 = vpop.f32.mrf.mxu2 }
  0xa7   :  { %v455_v6 = vpop.f32.mrf.mxu1  ;;  %v479_v8 = vpop.f32.mrf.mxu3  ;;  %v467_v14 = vadd.f32 %v466_v7, %v454_v13 }
  0xa9   :  { %v480_v15 = vadd.f32 %v479_v8, %v467_v14 }
  0xae   :  { %v468_v11 = vpop.f32.mrf.mxu2 }
  0xaf   :  { %v481_v12 = vpop.f32.mrf.mxu3 }
  0xbe   :  { %v492_v16 = vpop.f32.mrf.mxu0 }
  0xbf   :  { %v505_v17 = vpop.f32.mrf.mxu1  ;;  %v493_v18 = vadd.f32 %v492_v16, %v480_v15 }
  0xc1   :  { %v506_v19 = vadd.f32 %v505_v17, %v493_v18 }
  0xc3   :  { %v509_v20 = vmax.f32 %v506_v19, 0.0 }
  0xc5   :  { %v510_v21 = vpack.c.bf16 %v509_v20, %v509_v20 }
  0xc6   :  { %v494_v22 = vpop.f32.mrf.mxu0 }
  0xc7   :  { %v507_v23 = vpop.f32.mrf.mxu1  ;;  %838 = vmatmul.msk.bf16.vlgmr.msrb.gmra.mxu2 %vm541_vm0, %v510_v21  ;;  %839 = vmatmul.msk.bf16.vlgmr.msrb.gmra.mxu3 %vm541_vm0, %v510_v21 }
 0x14a   :  { %v554_v26 = vpop.f32.mrf.mxu2  ;;  %v567_v27 = vpop.f32.mrf.mxu3 }
 0x14b   :  { %v568_v28 = vadd.f32 %v567_v27, %v518_v25  ;;  %v555_v31 = vadd.f32 %v554_v26, %v517_v30 }
 0x14d   :  { %v571_v29 = vmul.f32 1.442695, %v568_v28  ;;  %v580_v37 = vmul.f32 %v555_v31, %v555_v31 }
 0x14f   :  { %898 = vpow2.f32 %v571_v29 }
 0x152   :  { %v556_v32 = vpop.f32.mrf.mxu2  ;;  %v569_v33 = vpop.f32.mrf.mxu3 }
 0x155   :  { %v899_v36 = vpop.eup %898 }
 0x156   :  { %v579_v38 = vmul.f32 %v899_v36, %v899_v36  ;;  %v574_v39 = vmul.f32 %v899_v36, %v573_v35 }
 0x158   :  { %v581_v41 = vadd.f32 %v580_v37, %v579_v38  ;;  %v575_v42 = vadd.f32 %v574_v39, %v555_v31 }
 0x15a   :  { %v582_v43 = vsub.f32 %v581_v41, %v568_v28  ;;  %576 = vst [vmem:[#allocation2] sm:$0x3] %v575_v42 }
 0x15b   :  { %609 = dma.vmem_to_hbm [thread:$0]  %s605_s22, 32, %s607_s5, [#allocation3]  }
 0x15c   :  { %v840_v44 = vadd.f32 -0.5, %v582_v43 }
 0x15e   :  { %v585_v45 = vsel %vm584_vm1, %v840_v44, 0.0 }
 0x15f   :  { %v587_v46 = vsel %vm586_vm2, %v585_v45, 0.0 }
 0x160   :  { %588 = vadd.xlane.f32.xlu0 %v587_v46 }
 0x1d3   :  { %v589_v47 = vpop.xlane.xlu0 %588 }
 0x1d4   :  { %v590_v48 = vrot.slane %v589_v47, 4 }
 0x1d6   :  { %v591_v49 = vadd.f32 %v590_v48, %v589_v47 }
 0x1d8   :  { %v592_v50 = vrot.slane %v591_v49, 2 }
 0x1da   :  { %v593_v51 = vadd.f32 %v592_v50, %v591_v49 }
 0x1dc   :  { %v594_v52 = vrot.slane %v593_v51, 1 }
 0x1de   :  { %v595_v53 = vadd.f32 %v594_v52, %v593_v51 }
 0x1e0   :  { %893 = vpush %v595_v53 }
 0x211   :  { %s894_s28 = spop %893 }
 0x212   :  { %598 = sst [smem:[#allocation5]] %s894_s28 }
 0x213   :  { %618 = dma.smem_to_hbm %s941_s29, 16, %s616_s27, [#allocation4]  }
 0x214   :  { %936 = dma.done.wait [#allocation3], 32  }
 0x215   :  { %937 = vsyncadd [#allocation3], 4294967264 }
 0x216   :  { %938 = dma.done.wait [#allocation4], 16  }
 0x217   :  { %939 = vsyncadd [#allocation4], 4294967280 }
 0x218   :  { %627 = sfence }
 0x219   :  { %628 = vsyncpa [#allocation3], 1 }
 0x21a   :  { %629 = vsyncpa [#allocation4], 1 }

</bundles_post_ra>
